<compile_context>
chip_gen: v7x
topology: tpu7x:2x2x1
jax: 0.10.0
libtpu: 0.0.40
codegen_flags: <defaults>
</compile_context>

<pallas_src>
import functools

import jax
import jax.numpy as jnp
from jax.experimental import pallas as pl
from jax.experimental.pallas import tpu as pltpu


# ----------------------------- Pallas kernel ---------------------------------

def _skip_tcn_kernel(num_layers, kernel_size, seg_len,
                     x_ref, w0_ref, b0_ref, w1_ref, b1_ref, w2_ref, b2_ref,
                     wfc_ref, bfc_ref, out_ref):
    """Whole batch in one invocation. Activations are (C, B*T): channels on sublanes,
    batch*time packed along lanes (lane index = b*seg_len + t)."""
    x = x_ref[...]                                    # (F, B*T) f32
    N = x.shape[1]
    C = w0_ref.shape[0]

    # Hoisted within-segment time index for every lane (JAX does not CSE broadcasts).
    lane = jax.lax.broadcasted_iota(jnp.int32, (C, N), 1)
    t_mod = lane % seg_len                            # position inside each batch segment

    def dot_bf16(w, a):
        # Weights are already bf16 (wrapper); cast activations, accumulate in f32 on MXU.
        return jnp.dot(w, a.astype(jnp.bfloat16), preferred_element_type=jnp.float32)

    # conv1d_1: 1x1 causal conv == pure channel mixing, (C, F) @ (F, B*T).
    y = dot_bf16(w0_ref[...], x) + b0_ref[...]        # (C, B*T) f32
    skip = jnp.zeros_like(y)

    for l in range(num_layers):                       # static unroll (L is small)
        d = 2 ** l
        shifts = [(kernel_size - 1 - k) * d for k in range(kernel_size)]
        # Segment-aware causal masks: computed ONCE per layer, reused by both convs.
        masks = {s: (t_mod >= s) for s in sorted(set(shifts)) if s > 0}

        def fused_taps(a):
            # Concatenate K shifted copies along channels (sublane axis, aligned):
            # one (C, K*C) @ (K*C, B*T) matmul replaces K small ones.
            taps = []
            for s in shifts:
                if s == 0:
                    taps.append(a)
                else:
                    rolled = pltpu.roll(a, shift=s, axis=1)        # XLU; wraps ...
                    taps.append(jnp.where(masks[s], rolled, 0.0))  # ... mask kills wrap/leak
            return taps[0] if len(taps) == 1 else jnp.concatenate(taps, axis=0)

        # --- conv1 (causal, dilated) + ReLU  (dropout == identity) ---
        h = jnp.maximum(dot_bf16(w1_ref[l], fused_taps(y)) + b1_ref[l], 0.0)
        # --- conv2 (causal, dilated) + ReLU ---
        o = jnp.maximum(dot_bf16(w2_ref[l], fused_taps(h)) + b2_ref[l], 0.0)
        # Skip-connection output and residual path.
        skip = skip + o
        y = jnp.maximum(o + y, 0.0)

    skip = jnp.maximum(skip, 0.0)                     # ReLU over summed skips
    out = dot_bf16(wfc_ref[...], skip) + bfc_ref[...] # (num_classes, B*T) f32
    out_ref[...] = out.astype(out_ref.dtype)


# ------------------------------- wrapper --------------------------------------

def skip_tcn_pallas(x, params, *, num_layers, kernel_size, num_classes):
    """x: (B, 1, F, T) float32 -> (B, num_classes, T) float32 (PyTorch layout)."""
    w0, b0, w1, b1, w2, b2, wfc, bfc = params
    x_bft = jnp.squeeze(x, axis=1)                    # (B, F, T)
    B, F, T = x_bft.shape
    C = w0.shape[0]
    L, K = num_layers, kernel_size

    # Lane-pack batch*time: (B, F, T) -> (F, B*T), lane index = b*T + t (layout plumbing).
    x_k = jnp.transpose(x_bft, (1, 0, 2)).reshape(F, B * T)

    wdt = jnp.bfloat16                                # MXU-native operand dtype
    w0_k = w0[:, :, 0].astype(wdt)                    # (C, F)
    b0_k = b0.reshape(C, 1)                           # biases stay f32 (lane broadcast)
    # Fuse K taps into one contraction: w[l, cout, cin, k] -> wk[l, cout, k*C + cin].
    w1_k = jnp.transpose(w1, (0, 1, 3, 2)).reshape(L, C, K * C).astype(wdt)
    w2_k = jnp.transpose(w2, (0, 1, 3, 2)).reshape(L, C, K * C).astype(wdt)
    b1_k = b1.reshape(L, C, 1)
    b2_k = b2.reshape(L, C, 1)
    wfc_k = wfc.astype(wdt)                           # (num_classes, C)
    bfc_k = bfc.reshape(num_classes, 1)

    # TODO(synk): for long sequences, tile the time axis (multiple-of-128 tiles with a causal
    #   left halo of 2*(K-1)*(2**L - 1) columns) on a "parallel" grid axis — this also keeps
    #   both v7x TensorCores busy and restores DMA/compute pipelining of the input.
    # TODO(synk): for larger L or C, stream per-layer weights via an "arbitrary" layer grid
    #   axis (y/skip held in VMEM scratch, pl.when init/finalize) instead of the static unroll.
    # TODO(synk): v5e variant — replace the (K*C, B*T) concat slab with K accumulate matmuls
    #   if the single vector-store slot becomes the bottleneck.

    kernel = functools.partial(_skip_tcn_kernel, num_layers, kernel_size, T)
    vmem = pl.BlockSpec(memory_space=pltpu.MemorySpace.VMEM)   # whole-array, VMEM-resident

    out = pl.pallas_call(
        kernel,
        out_shape=jax.ShapeDtypeStruct((num_classes, B * T), jnp.float32),
        in_specs=[vmem] * 9,
        out_specs=vmem,
    )(x_k, w0_k, b0_k, w1_k, b1_k, w2_k, b2_k, wfc_k, bfc_k)

    # (num_classes, B*T) -> (B, num_classes, T)
    return jnp.transpose(out.reshape(num_classes, B, T), (1, 0, 2))


# --------------------------- pure-JAX reference --------------------------------

def _causal_conv1d_ref(x_bct, w_oik, b, dilation):
    Kk = w_oik.shape[-1]
    pad = (Kk - 1) * dilation
    out = jax.lax.conv_general_dilated(
        x_bct, w_oik, window_strides=(1,), padding=[(pad, 0)],
        rhs_dilation=(dilation,), dimension_numbers=("NCH", "OIH", "NCH"))
    return out + b[None, :, None]


def skip_tcn_ref(x, params, *, num_layers, kernel_size, num_classes):
    w0, b0, w1, b1, w2, b2, wfc, bfc = params
    y = _causal_conv1d_ref(jnp.squeeze(x, 1), w0, b0, 1)
    skips = []
    for l in range(num_layers):
        d = 2 ** l
        h = jax.nn.relu(_causal_conv1d_ref(y, w1[l], b1[l], d))
        o = jax.nn.relu(_causal_conv1d_ref(h, w2[l], b2[l], d))
        skips.append(o)
        y = jax.nn.relu(o + y)
    s = jax.nn.relu(sum(skips))
    s = jnp.transpose(s, (0, 2, 1))
    out = s @ wfc.T + bfc
    return jnp.transpose(out, (0, 2, 1))


# --------------------------------- main -----------------------------------------

if __name__ == "__main__":
    # SkipTCN(num_classes=8, num_freqbins=16, out_channels=32, num_layers=3, kernel_size=2)
    # B*T = 128 so the packed lane axis is exactly one full vreg width (lane-dense).
    B, F, T = 2, 16, 64
    C, L, K, NUM_CLASSES = 32, 3, 2, 8

    key = jax.random.PRNGKey(0)
    ks = jax.random.split(key, 9)
    # Conv weights ~ N(0, 0.01) per init_weights; biases small deterministic values.
    w0 = 0.01 * jax.random.normal(ks[0], (C, F, 1), jnp.float32)      # conv1d_1 (1x1)
    b0 = 0.01 * jax.random.normal(ks[1], (C,), jnp.float32)
    w1 = 0.01 * jax.random.normal(ks[2], (L, C, C, K), jnp.float32)   # per-layer conv1
    b1 = 0.01 * jax.random.normal(ks[3], (L, C), jnp.float32)
    w2 = 0.01 * jax.random.normal(ks[4], (L, C, C, K), jnp.float32)   # per-layer conv2
    b2 = 0.01 * jax.random.normal(ks[5], (L, C), jnp.float32)
    wfc = 0.1 * jax.random.normal(ks[6], (NUM_CLASSES, C), jnp.float32)
    bfc = 0.1 * jax.random.normal(ks[7], (NUM_CLASSES,), jnp.float32)
    params = (w0, b0, w1, b1, w2, b2, wfc, bfc)

    x = jax.random.normal(ks[8], (B, 1, F, T), jnp.float32)

    out = skip_tcn_pallas(x, params, num_layers=L, kernel_size=K, num_classes=NUM_CLASSES)
    out = jax.block_until_ready(out)

    ref = skip_tcn_ref(x, params, num_layers=L, kernel_size=K, num_classes=NUM_CLASSES)
    assert out.shape == (B, NUM_CLASSES, T), out.shape
    # bf16 matmul operands (f32 accumulation) -> loosened tolerance vs the f32 reference.
    assert jnp.allclose(out, ref, rtol=2e-2, atol=5e-3), float(jnp.max(jnp.abs(out - ref)))

    # TODO(synk): dropout layers are identity (inference); weight_norm folded into weights.
    print("KERNEL_OK")
</pallas_src>

<mosaic_0001>
module attributes {stable_mosaic.version = 11 : i64} {
  func.func @_skip_tcn_kernel(%arg0: memref<16x128xf32, #tpu.memory_space<vmem>>, %arg1: memref<32x16xbf16, #tpu.memory_space<vmem>>, %arg2: memref<32x1xf32, #tpu.memory_space<vmem>>, %arg3: memref<3x32x64xbf16, #tpu.memory_space<vmem>>, %arg4: memref<3x32x1xf32, #tpu.memory_space<vmem>>, %arg5: memref<3x32x64xbf16, #tpu.memory_space<vmem>>, %arg6: memref<3x32x1xf32, #tpu.memory_space<vmem>>, %arg7: memref<8x32xbf16, #tpu.memory_space<vmem>>, %arg8: memref<8x1xf32, #tpu.memory_space<vmem>>, %arg9: memref<8x128xf32, #tpu.memory_space<vmem>>) attributes {dimension_semantics = [], scalar_prefetch = 0 : i64, scratch_operands = 0 : i64, tpu.core_type = #tpu.core_type<tc>} {
    %c0 = arith.constant 0 : index
    %c0_0 = arith.constant 0 : index
    %0 = vector.load %arg0[%c0, %c0_0] : memref<16x128xf32, #tpu.memory_space<vmem>>, vector<16x128xf32>
    %1 = tpu.iota {dimensions = array<i32: 1>} : vector<32x128xi32>
    %c64_i32 = arith.constant 64 : i32
    %c0_i32 = arith.constant 0 : i32
    %2 = arith.cmpi eq, %c64_i32, %c0_i32 : i32
    %c1_i32 = arith.constant 1 : i32
    %3 = arith.select %2, %c1_i32, %c64_i32 : i32
    %4 = vector.broadcast %3 : i32 to vector<32x128xi32>
    %5 = arith.remsi %1, %4 : vector<32x128xi32>
    %c0_i32_1 = arith.constant 0 : i32
    %6 = vector.broadcast %c0_i32_1 : i32 to vector<32x128xi32>
    %7 = arith.cmpi ne, %5, %6 : vector<32x128xi32>
    %c0_i32_2 = arith.constant 0 : i32
    %8 = vector.broadcast %c0_i32_2 : i32 to vector<32x128xi32>
    %9 = arith.cmpi slt, %5, %8 : vector<32x128xi32>
    %c0_i32_3 = arith.constant 0 : i32
    %10 = arith.cmpi slt, %3, %c0_i32_3 : i32
    %11 = vector.broadcast %10 : i1 to vector<32x128xi1>
    %12 = vector.broadcast %11 : vector<32x128xi1> to vector<32x128xi1>
    %13 = arith.xori %9, %12 : vector<32x128xi1>
    %14 = arith.andi %13, %7 : vector<32x128xi1>
    %15 = vector.broadcast %3 : i32 to vector<32x128xi32>
    %16 = arith.addi %5, %15 : vector<32x128xi32>
    %17 = arith.select %14, %16, %5 : vector<32x128xi1>, vector<32x128xi32>
    %c0_4 = arith.constant 0 : index
    %c0_5 = arith.constant 0 : index
    %18 = vector.load %arg1[%c0_4, %c0_5] : memref<32x16xbf16, #tpu.memory_space<vmem>>, vector<32x16xbf16>
    %19 = arith.truncf %0 : vector<16x128xf32> to vector<16x128xbf16>
    %cst = arith.constant dense<0.000000e+00> : vector<32x128xf32>
    %20 = tpu.matmul %18, %19, %cst {dimension_numbers = #tpu.dot_dimension_numbers<[1], [0], [0], [1], [0, 0, 1, 1], [], []>} : vector<32x16xbf16>, vector<16x128xbf16>, vector<32x128xf32> -> vector<32x128xf32>
    %c0_6 = arith.constant 0 : index
    %c0_7 = arith.constant 0 : index
    %21 = vector.load %arg2[%c0_6, %c0_7] : memref<32x1xf32, #tpu.memory_space<vmem>>, vector<32x1xf32>
    %22 = vector.broadcast %21 : vector<32x1xf32> to vector<32x128xf32>
    %23 = arith.addf %20, %22 : vector<32x128xf32>
    %cst_8 = arith.constant 0.000000e+00 : f32
    %24 = vector.broadcast %cst_8 : f32 to vector<32x128xf32>
    %c1_i32_9 = arith.constant 1 : i32
    %25 = vector.broadcast %c1_i32_9 : i32 to vector<32x128xi32>
    %26 = arith.cmpi sge, %17, %25 : vector<32x128xi32>
    %c0_10 = arith.constant 0 : index
    %c0_11 = arith.constant 0 : index
    %c0_12 = arith.constant 0 : index
    %27 = vector.load %arg3[%c0_10, %c0_11, %c0_12] : memref<3x32x64xbf16, #tpu.memory_space<vmem>>, vector<1x32x64xbf16>
    %28 = vector.shape_cast %27 : vector<1x32x64xbf16> to vector<32x64xbf16>
    %c1_i32_13 = arith.constant 1 : i32
    %29 = tpu.dynamic_rotate %23 by %c1_i32_13 dim 1 : vector<32x128xf32>, i32 -> vector<32x128xf32>
    %cst_14 = arith.constant 0.000000e+00 : f32
    %30 = vector.broadcast %cst_14 : f32 to vector<32x128xf32>
    %31 = arith.select %26, %29, %30 : vector<32x128xi1>, vector<32x128xf32>
    %32 = tpu.concatenate %31, %23 in 0 : vector<32x128xf32>, vector<32x128xf32> -> vector<64x128xf32>
    %33 = arith.truncf %32 : vector<64x128xf32> to vector<64x128xbf16>
    %cst_15 = arith.constant dense<0.000000e+00> : vector<32x128xf32>
    %34 = tpu.matmul %28, %33, %cst_15 {dimension_numbers = #tpu.dot_dimension_numbers<[1], [0], [0], [1], [0, 0, 1, 1], [], []>} : vector<32x64xbf16>, vector<64x128xbf16>, vector<32x128xf32> -> vector<32x128xf32>
    %c0_16 = arith.constant 0 : index
    %c0_17 = arith.constant 0 : index
    %c0_18 = arith.constant 0 : index
    %35 = vector.load %arg4[%c0_16, %c0_17, %c0_18] : memref<3x32x1xf32, #tpu.memory_space<vmem>>, vector<1x32x1xf32>
    %36 = vector.shape_cast %35 : vector<1x32x1xf32> to vector<32x1xf32>
    %37 = vector.broadcast %36 : vector<32x1xf32> to vector<32x128xf32>
    %38 = arith.addf %34, %37 : vector<32x128xf32>
    %cst_19 = arith.constant 0.000000e+00 : f32
    %39 = vector.broadcast %cst_19 : f32 to vector<32x128xf32>
    %40 = arith.maximumf %38, %39 : vector<32x128xf32>
    %c0_20 = arith.constant 0 : index
    %c0_21 = arith.constant 0 : index
    %c0_22 = arith.constant 0 : index
    %41 = vector.load %arg5[%c0_20, %c0_21, %c0_22] : memref<3x32x64xbf16, #tpu.memory_space<vmem>>, vector<1x32x64xbf16>
    %42 = vector.shape_cast %41 : vector<1x32x64xbf16> to vector<32x64xbf16>
    %c1_i32_23 = arith.constant 1 : i32
    %43 = tpu.dynamic_rotate %40 by %c1_i32_23 dim 1 : vector<32x128xf32>, i32 -> vector<32x128xf32>
    %cst_24 = arith.constant 0.000000e+00 : f32
    %44 = vector.broadcast %cst_24 : f32 to vector<32x128xf32>
    %45 = arith.select %26, %43, %44 : vector<32x128xi1>, vector<32x128xf32>
    %46 = tpu.concatenate %45, %40 in 0 : vector<32x128xf32>, vector<32x128xf32> -> vector<64x128xf32>
    %47 = arith.truncf %46 : vector<64x128xf32> to vector<64x128xbf16>
    %cst_25 = arith.constant dense<0.000000e+00> : vector<32x128xf32>
    %48 = tpu.matmul %42, %47, %cst_25 {dimension_numbers = #tpu.dot_dimension_numbers<[1], [0], [0], [1], [0, 0, 1, 1], [], []>} : vector<32x64xbf16>, vector<64x128xbf16>, vector<32x128xf32> -> vector<32x128xf32>
    %c0_26 = arith.constant 0 : index
    %c0_27 = arith.constant 0 : index
    %c0_28 = arith.constant 0 : index
    %49 = vector.load %arg6[%c0_26, %c0_27, %c0_28] : memref<3x32x1xf32, #tpu.memory_space<vmem>>, vector<1x32x1xf32>
    %50 = vector.shape_cast %49 : vector<1x32x1xf32> to vector<32x1xf32>
    %51 = vector.broadcast %50 : vector<32x1xf32> to vector<32x128xf32>
    %52 = arith.addf %48, %51 : vector<32x128xf32>
    %cst_29 = arith.constant 0.000000e+00 : f32
    %53 = vector.broadcast %cst_29 : f32 to vector<32x128xf32>
    %54 = arith.maximumf %52, %53 : vector<32x128xf32>
    %55 = arith.addf %24, %54 : vector<32x128xf32>
    %56 = arith.addf %54, %23 : vector<32x128xf32>
    %cst_30 = arith.constant 0.000000e+00 : f32
    %57 = vector.broadcast %cst_30 : f32 to vector<32x128xf32>
    %58 = arith.maximumf %56, %57 : vector<32x128xf32>
    %c2_i32 = arith.constant 2 : i32
    %59 = vector.broadcast %c2_i32 : i32 to vector<32x128xi32>
    %60 = arith.cmpi sge, %17, %59 : vector<32x128xi32>
    %c1 = arith.constant 1 : index
    %c0_31 = arith.constant 0 : index
    %c0_32 = arith.constant 0 : index
    %61 = vector.load %arg3[%c1, %c0_31, %c0_32] : memref<3x32x64xbf16, #tpu.memory_space<vmem>>, vector<1x32x64xbf16>
    %62 = vector.shape_cast %61 : vector<1x32x64xbf16> to vector<32x64xbf16>
    %c2_i32_33 = arith.constant 2 : i32
    %63 = tpu.dynamic_rotate %58 by %c2_i32_33 dim 1 : vector<32x128xf32>, i32 -> vector<32x128xf32>
    %cst_34 = arith.constant 0.000000e+00 : f32
    %64 = vector.broadcast %cst_34 : f32 to vector<32x128xf32>
    %65 = arith.select %60, %63, %64 : vector<32x128xi1>, vector<32x128xf32>
    %66 = tpu.concatenate %65, %58 in 0 : vector<32x128xf32>, vector<32x128xf32> -> vector<64x128xf32>
    %67 = arith.truncf %66 : vector<64x128xf32> to vector<64x128xbf16>
    %cst_35 = arith.constant dense<0.000000e+00> : vector<32x128xf32>
    %68 = tpu.matmul %62, %67, %cst_35 {dimension_numbers = #tpu.dot_dimension_numbers<[1], [0], [0], [1], [0, 0, 1, 1], [], []>} : vector<32x64xbf16>, vector<64x128xbf16>, vector<32x128xf32> -> vector<32x128xf32>
    %c1_36 = arith.constant 1 : index
    %c0_37 = arith.constant 0 : index
    %c0_38 = arith.constant 0 : index
    %69 = vector.load %arg4[%c1_36, %c0_37, %c0_38] : memref<3x32x1xf32, #tpu.memory_space<vmem>>, vector<1x32x1xf32>
    %70 = vector.shape_cast %69 : vector<1x32x1xf32> to vector<32x1xf32>
    %71 = vector.broadcast %70 : vector<32x1xf32> to vector<32x128xf32>
    %72 = arith.addf %68, %71 : vector<32x128xf32>
    %cst_39 = arith.constant 0.000000e+00 : f32
    %73 = vector.broadcast %cst_39 : f32 to vector<32x128xf32>
    %74 = arith.maximumf %72, %73 : vector<32x128xf32>
    %c1_40 = arith.constant 1 : index
    %c0_41 = arith.constant 0 : index
    %c0_42 = arith.constant 0 : index
    %75 = vector.load %arg5[%c1_40, %c0_41, %c0_42] : memref<3x32x64xbf16, #tpu.memory_space<vmem>>, vector<1x32x64xbf16>
    %76 = vector.shape_cast %75 : vector<1x32x64xbf16> to vector<32x64xbf16>
    %c2_i32_43 = arith.constant 2 : i32
    %77 = tpu.dynamic_rotate %74 by %c2_i32_43 dim 1 : vector<32x128xf32>, i32 -> vector<32x128xf32>
    %cst_44 = arith.constant 0.000000e+00 : f32
    %78 = vector.broadcast %cst_44 : f32 to vector<32x128xf32>
    %79 = arith.select %60, %77, %78 : vector<32x128xi1>, vector<32x128xf32>
    %80 = tpu.concatenate %79, %74 in 0 : vector<32x128xf32>, vector<32x128xf32> -> vector<64x128xf32>
    %81 = arith.truncf %80 : vector<64x128xf32> to vector<64x128xbf16>
    %cst_45 = arith.constant dense<0.000000e+00> : vector<32x128xf32>
    %82 = tpu.matmul %76, %81, %cst_45 {dimension_numbers = #tpu.dot_dimension_numbers<[1], [0], [0], [1], [0, 0, 1, 1], [], []>} : vector<32x64xbf16>, vector<64x128xbf16>, vector<32x128xf32> -> vector<32x128xf32>
    %c1_46 = arith.constant 1 : index
    %c0_47 = arith.constant 0 : index
    %c0_48 = arith.constant 0 : index
    %83 = vector.load %arg6[%c1_46, %c0_47, %c0_48] : memref<3x32x1xf32, #tpu.memory_space<vmem>>, vector<1x32x1xf32>
    %84 = vector.shape_cast %83 : vector<1x32x1xf32> to vector<32x1xf32>
    %85 = vector.broadcast %84 : vector<32x1xf32> to vector<32x128xf32>
    %86 = arith.addf %82, %85 : vector<32x128xf32>
    %cst_49 = arith.constant 0.000000e+00 : f32
    %87 = vector.broadcast %cst_49 : f32 to vector<32x128xf32>
    %88 = arith.maximumf %86, %87 : vector<32x128xf32>
    %89 = arith.addf %55, %88 : vector<32x128xf32>
    %90 = arith.addf %88, %58 : vector<32x128xf32>
    %cst_50 = arith.constant 0.000000e+00 : f32
    %91 = vector.broadcast %cst_50 : f32 to vector<32x128xf32>
    %92 = arith.maximumf %90, %91 : vector<32x128xf32>
    %c4_i32 = arith.constant 4 : i32
    %93 = vector.broadcast %c4_i32 : i32 to vector<32x128xi32>
    %94 = arith.cmpi sge, %17, %93 : vector<32x128xi32>
    %c2 = arith.constant 2 : index
    %c0_51 = arith.constant 0 : index
    %c0_52 = arith.constant 0 : index
    %95 = vector.load %arg3[%c2, %c0_51, %c0_52] : memref<3x32x64xbf16, #tpu.memory_space<vmem>>, vector<1x32x64xbf16>
    %96 = vector.shape_cast %95 : vector<1x32x64xbf16> to vector<32x64xbf16>
    %c4_i32_53 = arith.constant 4 : i32
    %97 = tpu.dynamic_rotate %92 by %c4_i32_53 dim 1 : vector<32x128xf32>, i32 -> vector<32x128xf32>
    %cst_54 = arith.constant 0.000000e+00 : f32
    %98 = vector.broadcast %cst_54 : f32 to vector<32x128xf32>
    %99 = arith.select %94, %97, %98 : vector<32x128xi1>, vector<32x128xf32>
    %100 = tpu.concatenate %99, %92 in 0 : vector<32x128xf32>, vector<32x128xf32> -> vector<64x128xf32>
    %101 = arith.truncf %100 : vector<64x128xf32> to vector<64x128xbf16>
    %cst_55 = arith.constant dense<0.000000e+00> : vector<32x128xf32>
    %102 = tpu.matmul %96, %101, %cst_55 {dimension_numbers = #tpu.dot_dimension_numbers<[1], [0], [0], [1], [0, 0, 1, 1], [], []>} : vector<32x64xbf16>, vector<64x128xbf16>, vector<32x128xf32> -> vector<32x128xf32>
    %c2_56 = arith.constant 2 : index
    %c0_57 = arith.constant 0 : index
    %c0_58 = arith.constant 0 : index
    %103 = vector.load %arg4[%c2_56, %c0_57, %c0_58] : memref<3x32x1xf32, #tpu.memory_space<vmem>>, vector<1x32x1xf32>
    %104 = vector.shape_cast %103 : vector<1x32x1xf32> to vector<32x1xf32>
    %105 = vector.broadcast %104 : vector<32x1xf32> to vector<32x128xf32>
    %106 = arith.addf %102, %105 : vector<32x128xf32>
    %cst_59 = arith.constant 0.000000e+00 : f32
    %107 = vector.broadcast %cst_59 : f32 to vector<32x128xf32>
    %108 = arith.maximumf %106, %107 : vector<32x128xf32>
    %c2_60 = arith.constant 2 : index
    %c0_61 = arith.constant 0 : index
    %c0_62 = arith.constant 0 : index
    %109 = vector.load %arg5[%c2_60, %c0_61, %c0_62] : memref<3x32x64xbf16, #tpu.memory_space<vmem>>, vector<1x32x64xbf16>
    %110 = vector.shape_cast %109 : vector<1x32x64xbf16> to vector<32x64xbf16>
    %c4_i32_63 = arith.constant 4 : i32
    %111 = tpu.dynamic_rotate %108 by %c4_i32_63 dim 1 : vector<32x128xf32>, i32 -> vector<32x128xf32>
    %cst_64 = arith.constant 0.000000e+00 : f32
    %112 = vector.broadcast %cst_64 : f32 to vector<32x128xf32>
    %113 = arith.select %94, %111, %112 : vector<32x128xi1>, vector<32x128xf32>
    %114 = tpu.concatenate %113, %108 in 0 : vector<32x128xf32>, vector<32x128xf32> -> vector<64x128xf32>
    %115 = arith.truncf %114 : vector<64x128xf32> to vector<64x128xbf16>
    %cst_65 = arith.constant dense<0.000000e+00> : vector<32x128xf32>
    %116 = tpu.matmul %110, %115, %cst_65 {dimension_numbers = #tpu.dot_dimension_numbers<[1], [0], [0], [1], [0, 0, 1, 1], [], []>} : vector<32x64xbf16>, vector<64x128xbf16>, vector<32x128xf32> -> vector<32x128xf32>
    %c2_66 = arith.constant 2 : index
    %c0_67 = arith.constant 0 : index
    %c0_68 = arith.constant 0 : index
    %117 = vector.load %arg6[%c2_66, %c0_67, %c0_68] : memref<3x32x1xf32, #tpu.memory_space<vmem>>, vector<1x32x1xf32>
    %118 = vector.shape_cast %117 : vector<1x32x1xf32> to vector<32x1xf32>
    %119 = vector.broadcast %118 : vector<32x1xf32> to vector<32x128xf32>
    %120 = arith.addf %116, %119 : vector<32x128xf32>
    %cst_69 = arith.constant 0.000000e+00 : f32
    %121 = vector.broadcast %cst_69 : f32 to vector<32x128xf32>
    %122 = arith.maximumf %120, %121 : vector<32x128xf32>
    %123 = arith.addf %89, %122 : vector<32x128xf32>
    %cst_70 = arith.constant 0.000000e+00 : f32
    %124 = vector.broadcast %cst_70 : f32 to vector<32x128xf32>
    %125 = arith.maximumf %123, %124 : vector<32x128xf32>
    %c0_71 = arith.constant 0 : index
    %c0_72 = arith.constant 0 : index
    %126 = vector.load %arg7[%c0_71, %c0_72] : memref<8x32xbf16, #tpu.memory_space<vmem>>, vector<8x32xbf16>
    %127 = arith.truncf %125 : vector<32x128xf32> to vector<32x128xbf16>
    %cst_73 = arith.constant dense<0.000000e+00> : vector<8x128xf32>
    %128 = tpu.matmul %126, %127, %cst_73 {dimension_numbers = #tpu.dot_dimension_numbers<[1], [0], [0], [1], [0, 0, 1, 1], [], []>} : vector<8x32xbf16>, vector<32x128xbf16>, vector<8x128xf32> -> vector<8x128xf32>
    %c0_74 = arith.constant 0 : index
    %c0_75 = arith.constant 0 : index
    %129 = vector.load %arg8[%c0_74, %c0_75] : memref<8x1xf32, #tpu.memory_space<vmem>>, vector<8x1xf32>
    %130 = vector.broadcast %129 : vector<8x1xf32> to vector<8x128xf32>
    %131 = arith.addf %128, %130 : vector<8x128xf32>
    %c0_76 = arith.constant 0 : index
    %c0_77 = arith.constant 0 : index
    %132 = vector.load %arg9[%c0_76, %c0_77] : memref<8x128xf32, #tpu.memory_space<vmem>>, vector<8x128xf32>
    tpu.vector_store %arg9[%c0_76, %c0_77], %131 {strides = array<i32>} : memref<8x128xf32, #tpu.memory_space<vmem>>, vector<8x128xf32>,
    return
  }
}

</mosaic_0001>

<bundles_post_ra>
// kernel: tpu_custom_call.1
= control target key start
LH: loop header
LB: loop body
LE: loop exit
PB: predicated region body
PF: predicated region fallthrough
CT: control target
= control target key end

     0   :  { %vm89_vm0 = vcmask 130048   ;;  %v1267_v4 = vmov 0   ;;  %s1661_s0 = inlined_call_operand.vmem [shape: f32[16,128], index: 0, kind: input, shape index: {}]   ;;  %s1662_s1 = inlined_call_operand.vmem [shape: bf16[32,16], index: 1, kind: input, shape index: {}]   ;;  %s1663_s2 = inlined_call_operand.vmem [shape: f32[32,1], index: 2, kind: input, shape index: {}]   ;;  %s1664_s3 = inlined_call_operand.vmem [shape: bf16[3,32,64], index: 3, kind: input, shape index: {}]   ;;  %s1665_s4 = inlined_call_operand.vmem [shape: f32[3,32,1], index: 4, kind: input, shape index: {}]   ;;  %s1666_s5 = inlined_call_operand.vmem [shape: bf16[3,32,64], index: 5, kind: input, shape index: {}]   ;;  %s1667_s6 = inlined_call_operand.vmem [shape: f32[3,32,1], index: 6, kind: input, shape index: {}]   ;;  %s1668_s7 = inlined_call_operand.vmem [shape: bf16[8,32], index: 7, kind: input, shape index: {}]   ;;  %s1669_s8 = inlined_call_operand.vmem [shape: f32[8,1], index: 8, kind: input, shape index: {}]   ;;  %s1670_s9 = inlined_call_operand.hbm [shape: f32[8,128], index: 9, kind: output, shape index: {}]  }
   0x1   :  { %v34_v0 = vld [vmem:[%s1661_s0] sm:$0xff]  ;;  %v35_v1 = vld [vmem:[%s1661_s0 + $0x8] sm:$0xff]  ;;  %1167 = vset.pattern.permute.xlu0 %v1267_v4  ;;  %1168 = vset.pattern.permute.xlu1 %v1267_v4  ;;  %v57_v7 = vld [vmem:[%s1663_s2 + $0x10] sm:$0xff] }
   0x2   :  { %v54_v2 = vpack.c.bf16 %v35_v1, %v34_v0  ;;  %v1229_v3 = vld [vmem:[%s1662_s1] sm:$0xff]   ;;  %v1230_v6 = vld [vmem:[%s1662_s1 + $0x8] sm:$0xff]   ;;  %v58_v9 = vld [vmem:[%s1663_s2 + $0x18] sm:$0xff]  ;;  %71 = vperm.xlu1 %1168, %v57_v7  }
   0x3   :  { %v55_v5 = vld [vmem:[%s1663_s2] sm:$0xff]  ;;  %1076 = vmatprep.mubr.msk.bf16.mxu0 %vm89_vm0, %v1229_v3  ;;  %v56_v8 = vld [vmem:[%s1663_s2 + $0x8] sm:$0xff] }
   0x4   :  { %1074 = vmatprep.subr.bf16.mxu0 %v54_v2  ;;  %61 = vperm.xlu0 %1167, %v55_v5  }
   0x5   :  { %1075 = vmatpush3.bf16.msra.mxu0 %v54_v2 }
   0x6   :  { %76 = vperm.xlu1 %1168, %v58_v9  }
   0x8   :  { %1077 = vmatmul.mubr.msk.bf16.vlgmr.msra.gmra.mrb[0].mxu0 %vm89_vm0, %v1230_v6  ;;  %66 = vperm.xlu0 %1167, %v56_v8  }
   0x9   :  { %14 = vsyncpa [#allocation3], 0  ;;  %s1268_s1 = smov 1   ;;  %v167_v24 = vld [vmem:[%s1665_s4 + $0x8] sm:$0xff]  ;;  %v166_v25 = vld [vmem:[%s1665_s4] sm:$0xff]  ;;  %vm200_vm1 = vcmask 523264   ;;  %v36_v29 = vlaneseq }
   0xa   :  { %v169_v26 = vld [vmem:[%s1665_s4 + $0x18] sm:$0xff]  ;;  %v1231_v27 = vld [vmem:[%s1664_s3] sm:$0xff]   ;;  %v168_v28 = vld [vmem:[%s1665_s4 + $0x10] sm:$0xff]  ;;  %s1269_s2 = smov 2   ;;  %s1270_s24 = smov 4   ;;  %vm1272_vm8 = vmmov 0  }
   0xb   :  { %1088 = vmatprep.mubr.msk.bf16.mxu1 %vm200_vm1, %v1231_v27  ;;  %v37_v30 = vand.u32 127, %v36_v29  ;;  %v1232_v43 = vld [vmem:[%s1664_s3 + $0x8] sm:$0xff]   ;;  %v280_v1 = vld [vmem:[%s1667_s6] sm:$0xff]  ;;  %v283_v2 = vld [vmem:[%s1667_s6 + $0x18] sm:$0xff]  ;;  %vm876_vm9 = vcmask 261120  }
   0xc   :  { %v281_v0 = vld [vmem:[%s1667_s6 + $0x8] sm:$0xff]  ;;  %v1233_v3 = vld [vmem:[%s1666_s5] sm:$0xff]   ;;  %v282_v4 = vld [vmem:[%s1667_s6 + $0x10] sm:$0xff] }
   0xd   :  { %v1380_v31 = vand.u32 63, %v37_v30  ;;  %1100 = vmatprep.mubr.msk.bf16.mxu0 %vm200_vm1, %v1233_v3 }
   0xf   :  { %vm145_vm2 = vcmp.ge.s32.totalorder %v1380_v31, 1  ;;  %vm385_vm4 = vcmp.ge.s32.totalorder %v1380_v31, 2  ;;  %vm628_vm6 = vcmp.ge.s32.totalorder %v1380_v31, 4  ;;  %v1240_v31 = vld [vmem:[%s1664_s3 + $0x28] sm:$0xff]  }
  0x10   :  { %vm1383_vm3 = vmpackc.low %vm145_vm2, %vm145_vm2 }
  0x11   :  { %vm1488_vm5 = vmpackc.low %vm385_vm4, %vm385_vm4 }
  0x12   :  { %vm1581_vm7 = vmpackc.low %vm628_vm6, %vm628_vm6 }
  0x81   :  { %v72_v10 = vpop.permute.xlu1 %71 }
  0x83   :  { %v62_v11 = vpop.permute.xlu0 %61 }
  0x85   :  { %v77_v13 = vpop.permute.xlu1 %76 }
  0x87   :  { %v67_v16 = vpop.permute.xlu0 %66 }
  0xdb   :  { %v1078_v12 = vpop.f32.mrb[0].mxu0 }
  0xdc   :  { %v130_v14 = vpop.f32.mrb[1].mxu0  ;;  %v1350_v17 = vadd.f32 %v1078_v12, %v72_v10 }
  0xdd   :  { %v1079_v15 = vpop.f32.mrb[2].mxu0  ;;  %v1354_v20 = vadd.f32 %v130_v14, %v62_v11 }
  0xde   :  { %v1352_v18 = vadd.f32 %v1079_v15, %v77_v13  ;;  %v133_v19 = vpop.f32.mrb[3].mxu0  ;;  %v1234_v13 = vld [vmem:[%s1666_s5 + $0x8] sm:$0xff]  }
  0xdf   :  { %v1356_v21 = vadd.f32 %v133_v19, %v67_v16 }
  0xe0   :  { %v1174_v22 = vpack.i.bf16 %v1352_v18, %v1350_v17  ;;  %v165_v42 = vpack.c.bf16 %v1352_v18, %v1350_v17 }
  0xe1   :  { %v1169_v23 = vpack.i.bf16 %v1356_v21, %v1354_v20  ;;  %v164_v41 = vpack.c.bf16 %v1356_v21, %v1354_v20 }
  0xe2   :  { %1175 = vrot.lane.b32.xlu1 %v1174_v22, %s1268_s1 }
  0xe3   :  { %1170 = vrot.lane.b32.xlu0 %v1169_v23, %s1268_s1 }
  0xe6   :  { %177 = vperm.xlu1 %1168, %v167_v24  }
  0xe7   :  { %172 = vperm.xlu0 %1167, %v166_v25  }
  0xea   :  { %187 = vperm.xlu1 %1168, %v169_v26  }
  0xeb   :  { %182 = vperm.xlu0 %1167, %v168_v28  }
 0x154   :  { %v1176_v32 = vpop.permute.xlu1 %1175 }
 0x155   :  { %v1171_v33 = vpop.permute.xlu0 %1170  ;;  %v1178_v34 = vunpack.i.h.bf16 %v1176_v32  ;;  %v1177_v35 = vunpack.i.l.bf16 %v1176_v32 }
 0x156   :  { %v1173_v36 = vunpack.i.h.bf16 %v1171_v33  ;;  %v1172_v37 = vunpack.i.l.bf16 %v1171_v33 }
 0x157   :  { %v945_v40 = vpack.c.bf16 %v1178_v34, %v1177_v35 }
 0x158   :  { %v942_v39 = vpack.c.bf16 %v1173_v36, %v1172_v37 }
 0x15a   :  { %1080 = vmatprep.subr.msk.bf16.mxu1 %vm1383_vm3, %v942_v39 }
 0x15b   :  { %1081 = vmatpush3.bf16.msk.msra.mxu1 %vm1383_vm3, %v942_v39 }
 0x15c   :  { %1082 = vmatprep.subr.msk.bf16.mxu1 %vm1383_vm3, %v945_v40 }
 0x15f   :  { %1083 = vmatpush3.bf16.msk.msra.mxu1 %vm1383_vm3, %v945_v40 }
 0x160   :  { %1084 = vmatprep.subr.bf16.mxu1 %v164_v41 }
 0x163   :  { %1085 = vmatpush3.bf16.msra.mxu1 %v164_v41 }
 0x164   :  { %1086 = vmatprep.subr.bf16.mxu1 %v165_v42 }
 0x165   :  { %v178_v45 = vpop.permute.xlu1 %177 }
 0x166   :  { %v173_v44 = vpop.permute.xlu0 %172 }
 0x167   :  { %1087 = vmatpush3.bf16.msra.mxu1 %v165_v42 }
 0x169   :  { %v188_v50 = vpop.permute.xlu1 %187 }
 0x16a   :  { %1089 = vmatmul.mubr.msk.bf16.vlgmr.msra.gmra.mrb[0].mxu1 %vm200_vm1, %v1232_v43  ;;  %v183_v46 = vpop.permute.xlu0 %182  ;;  %v966_v43 = vld [vmem:[%s1665_s4 + $0x38] sm:$0xff] }
 0x23d   :  { %v1090_v47 = vpop.f32.mrb[0].mxu1 }
 0x23e   :  { %v250_v48 = vadd.f32 %v1090_v47, %v183_v46  ;;  %v241_v49 = vpop.f32.mrb[1].mxu1 }
 0x23f   :  { %v242_v51 = vadd.f32 %v241_v49, %v173_v44  ;;  %v1091_v52 = vpop.f32.mrb[2].mxu1  ;;  %v1235_v44 = vld [vmem:[%s1664_s3 + $0x10] sm:$0xff]  }
 0x240   :  { %v253_v53 = vadd.f32 %v1091_v52, %v188_v50  ;;  %v244_v54 = vpop.f32.mrb[3].mxu1  ;;  %v258_v56 = vmax.f32 %v250_v48, 0.0  ;;  %1112 = vmatprep.mubr.msk.bf16.mxu1 %vm200_vm1, %v1235_v44 }
 0x241   :  { %v245_v55 = vadd.f32 %v244_v54, %v178_v45  ;;  %v256_v58 = vmax.f32 %v242_v51, 0.0  ;;  %v965_v45 = vld [vmem:[%s1665_s4 + $0x30] sm:$0xff] }
 0x242   :  { %v259_v57 = vmax.f32 %v253_v53, 0.0 }
 0x243   :  { %v257_v59 = vmax.f32 %v245_v55, 0.0 }
 0x244   :  { %v1184_v60 = vpack.i.bf16 %v259_v57, %v258_v56  ;;  %v279_v61 = vpack.c.bf16 %v259_v57, %v258_v56  ;;  %v1236_v57 = vld [vmem:[%s1664_s3 + $0x18] sm:$0xff]  }
 0x245   :  { %v1179_v62 = vpack.i.bf16 %v257_v59, %v256_v58  ;;  %v278_v63 = vpack.c.bf16 %v257_v59, %v256_v58 }
 0x246   :  { %1185 = vrot.lane.b32.xlu1 %v1184_v60, %s1268_s1 }
 0x247   :  { %1180 = vrot.lane.b32.xlu0 %v1179_v62, %s1268_s1 }
 0x24a   :  { %291 = vperm.xlu1 %1168, %v281_v0  }
 0x24b   :  { %286 = vperm.xlu0 %1167, %v280_v1  }
 0x24e   :  { %301 = vperm.xlu1 %1168, %v283_v2  }
 0x24f   :  { %296 = vperm.xlu0 %1167, %v282_v4  }
 0x2b8   :  { %v1186_v5 = vpop.permute.xlu1 %1185 }
 0x2b9   :  { %v1181_v6 = vpop.permute.xlu0 %1180  ;;  %v1188_v7 = vunpack.i.h.bf16 %v1186_v5  ;;  %v1187_v8 = vunpack.i.l.bf16 %v1186_v5 }
 0x2ba   :  { %v1183_v9 = vunpack.i.h.bf16 %v1181_v6  ;;  %v1182_v10 = vunpack.i.l.bf16 %v1181_v6 }
 0x2bb   :  { %v955_v12 = vpack.c.bf16 %v1188_v7, %v1187_v8 }
 0x2bc   :  { %v952_v11 = vpack.c.bf16 %v1183_v9, %v1182_v10 }
 0x2be   :  { %1092 = vmatprep.subr.msk.bf16.mxu0 %vm1383_vm3, %v952_v11 }
 0x2bf   :  { %1093 = vmatpush3.bf16.msk.msra.mxu0 %vm1383_vm3, %v952_v11 }
 0x2c0   :  { %1094 = vmatprep.subr.msk.bf16.mxu0 %vm1383_vm3, %v955_v12 }
 0x2c3   :  { %1095 = vmatpush3.bf16.msk.msra.mxu0 %vm1383_vm3, %v955_v12 }
 0x2c4   :  { %1096 = vmatprep.subr.bf16.mxu0 %v278_v63 }
 0x2c7   :  { %1097 = vmatpush3.bf16.msra.mxu0 %v278_v63 }
 0x2c8   :  { %1098 = vmatprep.subr.bf16.mxu0 %v279_v61 }
 0x2c9   :  { %v292_v15 = vpop.permute.xlu1 %291 }
 0x2ca   :  { %v287_v14 = vpop.permute.xlu0 %286 }
 0x2cb   :  { %1099 = vmatpush3.bf16.msra.mxu0 %v279_v61 }
 0x2cd   :  { %v302_v24 = vpop.permute.xlu1 %301 }
 0x2ce   :  { %1101 = vmatmul.mubr.msk.bf16.vlgmr.msra.gmra.mrb[4].mxu0 %vm200_vm1, %v1234_v13  ;;  %v297_v16 = vpop.permute.xlu0 %296 }
 0x3a1   :  { %v1102_v19 = vpop.f32.mrb[4].mxu0 }
 0x3a2   :  { %v1433_v22 = vadd.f32 %v1102_v19, %v297_v16  ;;  %v354_v23 = vpop.f32.mrb[5].mxu0  ;;  %v984_v16 = vld [vmem:[%s1667_s6 + $0x38] sm:$0xff]  ;;  %v1237_v19 = vld [vmem:[%s1666_s5 + $0x10] sm:$0xff]  }
 0x3a3   :  { %v1435_v25 = vadd.f32 %v354_v23, %v287_v14  ;;  %v1103_v26 = vpop.f32.mrb[6].mxu0  ;;  %v982_v14 = vld [vmem:[%s1667_s6 + $0x28] sm:$0xff]  ;;  %v983_v23 = vld [vmem:[%s1667_s6 + $0x30] sm:$0xff]  ;;  %1124 = vmatprep.mubr.msk.bf16.mxu0 %vm200_vm1, %v1237_v19 }
 0x3a4   :  { %v371_v27 = vmax.f32 %v1433_v22, 0.0  ;;  %v1438_v28 = vadd.f32 %v1103_v26, %v302_v24  ;;  %v357_v29 = vpop.f32.mrb[7].mxu0 }
 0x3a5   :  { %v369_v30 = vmax.f32 %v1435_v25, 0.0  ;;  %v1441_v32 = vadd.f32 %v357_v29, %v292_v15  ;;  %v981_v15 = vld [vmem:[%s1667_s6 + $0x20] sm:$0xff] }
 0x3a6   :  { %v379_v33 = vadd.f32 %v371_v27, %v1350_v17  ;;  %v372_v34 = vmax.f32 %v1438_v28, 0.0 }
 0x3a7   :  { %v377_v35 = vadd.f32 %v369_v30, %v1354_v20  ;;  %v370_v36 = vmax.f32 %v1441_v32, 0.0  ;;  %v867_v32 = vld [vmem:[%s1668_s7] sm:$0xf] }
 0x3a8   :  { %v380_v37 = vadd.f32 %v372_v34, %v1352_v18  ;;  %v1457_v39 = vmax.f32 %v379_v33, 0.0  ;;  %v964_v18 = vld [vmem:[%s1665_s4 + $0x28] sm:$0xff] }
 0x3a9   :  { %v378_v38 = vadd.f32 %v370_v36, %v1356_v21  ;;  %v1461_v17 = vmax.f32 %v377_v35, 0.0  ;;  %v963_v21 = vld [vmem:[%s1665_s4 + $0x20] sm:$0xff] }
 0x3aa   :  { %v1459_v40 = vmax.f32 %v380_v37, 0.0 }
 0x3ab   :  { %v1463_v41 = vmax.f32 %v378_v38, 0.0 }
 0x3ac   :  { %v1194_v20 = vpack.i.bf16 %v1459_v40, %v1457_v39  ;;  %v406_v56 = vpack.c.bf16 %v1459_v40, %v1457_v39 }
 0x3ad   :  { %v1189_v42 = vpack.i.bf16 %v1463_v41, %v1461_v17  ;;  %v405_v55 = vpack.c.bf16 %v1463_v41, %v1461_v17 }
 0x3ae   :  { %1195 = vrot.lane.b32.xlu1 %v1194_v20, %s1269_s2 }
 0x3af   :  { %1190 = vrot.lane.b32.xlu0 %v1189_v42, %s1269_s2  ;;  %v1238_v42 = vld [vmem:[%s1666_s5 + $0x18] sm:$0xff]  }
 0x3b2   :  { %419 = vperm.xlu1 %1168, %v964_v18  }
 0x3b3   :  { %414 = vperm.xlu0 %1167, %v963_v21  }
 0x3b6   :  { %429 = vperm.xlu1 %1168, %v966_v43  }
 0x3b7   :  { %424 = vperm.xlu0 %1167, %v965_v45  }
 0x420   :  { %v1196_v46 = vpop.permute.xlu1 %1195 }
 0x421   :  { %v1191_v47 = vpop.permute.xlu0 %1190  ;;  %v1198_v48 = vunpack.i.h.bf16 %v1196_v46  ;;  %v1197_v49 = vunpack.i.l.bf16 %v1196_v46 }
 0x422   :  { %v1193_v50 = vunpack.i.h.bf16 %v1191_v47  ;;  %v1192_v51 = vunpack.i.l.bf16 %v1191_v47 }
 0x423   :  { %v973_v54 = vpack.c.bf16 %v1198_v48, %v1197_v49 }
 0x424   :  { %v970_v53 = vpack.c.bf16 %v1193_v50, %v1192_v51 }
 0x426   :  { %1104 = vmatprep.subr.msk.bf16.mxu1 %vm1488_vm5, %v970_v53 }
 0x427   :  { %1105 = vmatpush3.bf16.msk.msra.mxu1 %vm1488_vm5, %v970_v53 }
 0x428   :  { %1106 = vmatprep.subr.msk.bf16.mxu1 %vm1488_vm5, %v973_v54 }
 0x42b   :  { %1107 = vmatpush3.bf16.msk.msra.mxu1 %vm1488_vm5, %v973_v54 }
 0x42c   :  { %1108 = vmatprep.subr.bf16.mxu1 %v405_v55 }
 0x42f   :  { %1109 = vmatpush3.bf16.msra.mxu1 %v405_v55 }
 0x430   :  { %1110 = vmatprep.subr.bf16.mxu1 %v406_v56 }
 0x431   :  { %v420_v59 = vpop.permute.xlu1 %419 }
 0x432   :  { %v415_v58 = vpop.permute.xlu0 %414 }
 0x433   :  { %1111 = vmatpush3.bf16.msra.mxu1 %v406_v56 }
 0x435   :  { %v430_v0 = vpop.permute.xlu1 %429 }
 0x436   :  { %1113 = vmatmul.mubr.msk.bf16.vlgmr.msra.gmra.mrb[4].mxu1 %vm200_vm1, %v1236_v57  ;;  %v425_v60 = vpop.permute.xlu0 %424 }
 0x509   :  { %v1114_v61 = vpop.f32.mrb[4].mxu1 }
 0x50a   :  { %v491_v62 = vadd.f32 %v1114_v61, %v425_v60  ;;  %v482_v63 = vpop.f32.mrb[5].mxu1 }
 0x50b   :  { %v483_v1 = vadd.f32 %v482_v63, %v415_v58  ;;  %v1115_v2 = vpop.f32.mrb[6].mxu1 }
 0x50c   :  { %v494_v3 = vadd.f32 %v1115_v2, %v430_v0  ;;  %v485_v4 = vpop.f32.mrb[7].mxu1  ;;  %v499_v6 = vmax.f32 %v491_v62, 0.0 }
 0x50d   :  { %v486_v5 = vadd.f32 %v485_v4, %v420_v59  ;;  %v497_v8 = vmax.f32 %v483_v1, 0.0  ;;  %v1239_v4 = vld [vmem:[%s1664_s3 + $0x20] sm:$0xff]  }
 0x50e   :  { %v500_v7 = vmax.f32 %v494_v3, 0.0  ;;  %1136 = vmatprep.mubr.msk.bf16.mxu1 %vm200_vm1, %v1239_v4 }
 0x50f   :  { %v498_v9 = vmax.f32 %v486_v5, 0.0  ;;  %v1001_v5 = vld [vmem:[%s1665_s4 + $0x50] sm:$0xff] }
 0x510   :  { %v1204_v10 = vpack.i.bf16 %v500_v7, %v499_v6  ;;  %v521_v11 = vpack.c.bf16 %v500_v7, %v499_v6 }
 0x511   :  { %v1199_v12 = vpack.i.bf16 %v498_v9, %v497_v8  ;;  %v520_v13 = vpack.c.bf16 %v498_v9, %v497_v8 }
 0x512   :  { %1205 = vrot.lane.b32.xlu1 %v1204_v10, %s1269_s2 }
 0x513   :  { %1200 = vrot.lane.b32.xlu0 %v1199_v12, %s1269_s2 }
 0x516   :  { %534 = vperm.xlu1 %1168, %v982_v14  }
 0x517   :  { %529 = vperm.xlu0 %1167, %v981_v15  }
 0x51a   :  { %544 = vperm.xlu1 %1168, %v984_v16  }
 0x51b   :  { %539 = vperm.xlu0 %1167, %v983_v23  }
 0x584   :  { %v1206_v24 = vpop.permute.xlu1 %1205 }
 0x585   :  { %v1201_v26 = vpop.permute.xlu0 %1200  ;;  %v1208_v29 = vunpack.i.h.bf16 %v1206_v24  ;;  %v1207_v33 = vunpack.i.l.bf16 %v1206_v24 }
 0x586   :  { %v1203_v35 = vunpack.i.h.bf16 %v1201_v26  ;;  %v1202_v37 = vunpack.i.l.bf16 %v1201_v26 }
 0x587   :  { %v991_v20 = vpack.c.bf16 %v1208_v29, %v1207_v33 }
 0x588   :  { %v988_v38 = vpack.c.bf16 %v1203_v35, %v1202_v37 }
 0x58a   :  { %1116 = vmatprep.subr.msk.bf16.mxu0 %vm1488_vm5, %v988_v38 }
 0x58b   :  { %1117 = vmatpush3.bf16.msk.msra.mxu0 %vm1488_vm5, %v988_v38 }
 0x58c   :  { %1118 = vmatprep.subr.msk.bf16.mxu0 %vm1488_vm5, %v991_v20 }
 0x58f   :  { %1119 = vmatpush3.bf16.msk.msra.mxu0 %vm1488_vm5, %v991_v20 }
 0x590   :  { %1120 = vmatprep.subr.bf16.mxu0 %v520_v13 }
 0x593   :  { %1121 = vmatpush3.bf16.msra.mxu0 %v520_v13 }
 0x594   :  { %1122 = vmatprep.subr.bf16.mxu0 %v521_v11 }
 0x595   :  { %v535_v21 = vpop.permute.xlu1 %534 }
 0x596   :  { %v530_v18 = vpop.permute.xlu0 %529 }
 0x597   :  { %1123 = vmatpush3.bf16.msra.mxu0 %v521_v11 }
 0x599   :  { %v545_v47 = vpop.permute.xlu1 %544 }
 0x59a   :  { %1125 = vmatmul.mubr.msk.bf16.vlgmr.msra.gmra.mrb[8].mxu0 %vm200_vm1, %v1238_v42  ;;  %v540_v43 = vpop.permute.xlu0 %539 }
 0x66d   :  { %v1126_v44 = vpop.f32.mrb[8].mxu0 }
 0x66e   :  { %v1538_v45 = vadd.f32 %v1126_v44, %v540_v43  ;;  %v597_v46 = vpop.f32.mrb[9].mxu0 }
 0x66f   :  { %v1540_v48 = vadd.f32 %v597_v46, %v530_v18  ;;  %v1127_v49 = vpop.f32.mrb[10].mxu0 }
 0x670   :  { %v614_v50 = vmax.f32 %v1538_v45, 0.0  ;;  %v1543_v51 = vadd.f32 %v1127_v49, %v545_v47  ;;  %v600_v52 = vpop.f32.mrb[11].mxu0 }
 0x671   :  { %v612_v53 = vmax.f32 %v1540_v48, 0.0  ;;  %v1546_v54 = vadd.f32 %v600_v52, %v535_v21  ;;  %v1018_v52 = vld [vmem:[%s1667_s6 + $0x48] sm:$0xff] }
 0x672   :  { %v622_v55 = vadd.f32 %v614_v50, %v1457_v39  ;;  %v615_v56 = vmax.f32 %v1543_v51, 0.0 }
 0x673   :  { %v620_v57 = vadd.f32 %v612_v53, %v1461_v17  ;;  %v613_v58 = vmax.f32 %v1546_v54, 0.0  ;;  %v999_v17 = vld [vmem:[%s1665_s4 + $0x40] sm:$0xff] }
 0x674   :  { %v623_v59 = vadd.f32 %v615_v56, %v1459_v40  ;;  %v626_v61 = vmax.f32 %v622_v55, 0.0  ;;  %v1000_v40 = vld [vmem:[%s1665_s4 + $0x48] sm:$0xff]  ;;  %v1017_v55 = vld [vmem:[%s1667_s6 + $0x40] sm:$0xff] }
 0x675   :  { %v621_v60 = vadd.f32 %v613_v58, %v1463_v41  ;;  %v624_v63 = vmax.f32 %v620_v57, 0.0  ;;  %v1002_v41 = vld [vmem:[%s1665_s4 + $0x58] sm:$0xff] }
 0x676   :  { %v627_v62 = vmax.f32 %v623_v59, 0.0  ;;  %v1020_v57 = vld [vmem:[%s1667_s6 + $0x58] sm:$0xff]  ;;  %v1241_v59 = vld [vmem:[%s1666_s5 + $0x20] sm:$0xff]  }
 0x677   :  { %v625_v39 = vmax.f32 %v621_v60, 0.0  ;;  %v1019_v60 = vld [vmem:[%s1667_s6 + $0x50] sm:$0xff]  ;;  %1148 = vmatprep.mubr.msk.bf16.mxu0 %vm200_vm1, %v1241_v59 }
 0x678   :  { %v1214_v0 = vpack.i.bf16 %v627_v62, %v626_v61  ;;  %v649_v1 = vpack.c.bf16 %v627_v62, %v626_v61  ;;  %v870_v61 = vld [vmem:[%s1669_s8] sm:$0xff] }
 0x679   :  { %v1209_v2 = vpack.i.bf16 %v625_v39, %v624_v63  ;;  %v648_v3 = vpack.c.bf16 %v625_v39, %v624_v63 }
 0x67a   :  { %1215 = vrot.lane.b32.xlu1 %v1214_v0, %s1270_s24 }
 0x67b   :  { %1210 = vrot.lane.b32.xlu0 %v1209_v2, %s1270_s24 }
 0x67e   :  { %662 = vperm.xlu1 %1168, %v1000_v40  }
 0x67f   :  { %657 = vperm.xlu0 %1167, %v999_v17   ;;  %v1242_v17 = vld [vmem:[%s1666_s5 + $0x28] sm:$0xff]  }
 0x682   :  { %672 = vperm.xlu1 %1168, %v1002_v41   ;;  %v1271_v41 = vmov 0.0  }
 0x683   :  { %667 = vperm.xlu0 %1167, %v1001_v5  }
 0x6ec   :  { %v1216_v6 = vpop.permute.xlu1 %1215 }
 0x6ed   :  { %v1211_v7 = vpop.permute.xlu0 %1210  ;;  %v1218_v8 = vunpack.i.h.bf16 %v1216_v6  ;;  %v1217_v9 = vunpack.i.l.bf16 %v1216_v6 }
 0x6ee   :  { %v1213_v10 = vunpack.i.h.bf16 %v1211_v7  ;;  %v1212_v11 = vunpack.i.l.bf16 %v1211_v7 }
 0x6ef   :  { %v1009_v14 = vpack.c.bf16 %v1218_v8, %v1217_v9 }
 0x6f0   :  { %v1006_v13 = vpack.c.bf16 %v1213_v10, %v1212_v11 }
 0x6f2   :  { %1128 = vmatprep.subr.msk.bf16.mxu1 %vm1581_vm7, %v1006_v13 }
 0x6f3   :  { %1129 = vmatpush3.bf16.msk.msra.mxu1 %vm1581_vm7, %v1006_v13  ;;  %v618_v13 = vadd.f32 %v614_v50, %v371_v27  ;;  %v617_v27 = vadd.f32 %v613_v58, %v370_v36 }
 0x6f4   :  { %1130 = vmatprep.subr.msk.bf16.mxu1 %vm1581_vm7, %v1009_v14 }
 0x6f7   :  { %1131 = vmatpush3.bf16.msk.msra.mxu1 %vm1581_vm7, %v1009_v14 }
 0x6f8   :  { %1132 = vmatprep.subr.bf16.mxu1 %v648_v3 }
 0x6fb   :  { %1133 = vmatpush3.bf16.msra.mxu1 %v648_v3 }
 0x6fc   :  { %1134 = vmatprep.subr.bf16.mxu1 %v649_v1 }
 0x6fd   :  { %v663_v16 = vpop.permute.xlu1 %662 }
 0x6fe   :  { %v658_v15 = vpop.permute.xlu0 %657 }
 0x6ff   :  { %1135 = vmatpush3.bf16.msra.mxu1 %v649_v1 }
 0x700   :  { %1152 = vmatprep.subr.bf16.mxu1 %v1271_v41 }
 0x701   :  { %v673_v29 = vpop.permute.xlu1 %672 }
 0x702   :  { %1137 = vmatmul.mubr.msk.bf16.vlgmr.msra.gmra.mrb[8].mxu1 %vm200_vm1, %v1240_v31  ;;  %v668_v19 = vpop.permute.xlu0 %667 }
 0x703   :  { %1156 = vmatprep.mubr.msk.bf16.mxu1 %vm1272_vm8, %v1271_v41 }
 0x7d5   :  { %v1138_v23 = vpop.f32.mrb[8].mxu1 }
 0x7d6   :  { %v734_v24 = vadd.f32 %v1138_v23, %v668_v19  ;;  %v725_v26 = vpop.f32.mrb[9].mxu1 }
 0x7d7   :  { %v726_v33 = vadd.f32 %v725_v26, %v658_v15  ;;  %v1139_v35 = vpop.f32.mrb[10].mxu1 }
 0x7d8   :  { %v737_v37 = vadd.f32 %v1139_v35, %v673_v29  ;;  %v728_v38 = vpop.f32.mrb[11].mxu1  ;;  %v742_v42 = vmax.f32 %v734_v24, 0.0  ;;  %v619_v24 = vadd.f32 %v615_v56, %v372_v34 }
 0x7d9   :  { %v729_v20 = vadd.f32 %v728_v38, %v663_v16  ;;  %v740_v21 = vmax.f32 %v726_v33, 0.0  ;;  %v616_v16 = vadd.f32 %v612_v53, %v369_v30 }
 0x7da   :  { %v743_v18 = vmax.f32 %v737_v37, 0.0 }
 0x7db   :  { %v741_v43 = vmax.f32 %v729_v20, 0.0 }
 0x7dc   :  { %v1224_v44 = vpack.i.bf16 %v743_v18, %v742_v42  ;;  %v764_v46 = vpack.c.bf16 %v743_v18, %v742_v42 }
 0x7dd   :  { %v1219_v47 = vpack.i.bf16 %v741_v43, %v740_v21  ;;  %v763_v49 = vpack.c.bf16 %v741_v43, %v740_v21 }
 0x7de   :  { %1225 = vrot.lane.b32.xlu1 %v1224_v44, %s1270_s24 }
 0x7df   :  { %1220 = vrot.lane.b32.xlu0 %v1219_v47, %s1270_s24  ;;  %s1273_s24 = smov [#allocation2]  }
 0x7e0   :  { %s927_s25 = sshll.u32 %s1273_s24, 4  ;;  %s928_s25 = int_to_ptr.vmem [resolvable:$true] %s927_s25 }
 0x7e1   :  { %s1243_s26 = scalar_lea.vmem %s928_s25, 128  ;;  %p1248_p1 = scmp.lt.s32.totalorder %s928_s25, %s928_s25 }
 0x7e2   :  { %777 = vperm.xlu1 %1168, %v1018_v52   ;;  %p1244_p0 = scmp.ne.s32.totalorder %s928_s25, %s1243_s26  ;;  %p1249_p2 = scmp.lt.s32.totalorder %s1243_s26, %s1243_s26 }
 0x7e3   :  { %772 = vperm.xlu0 %1167, %v1017_v55  }
 0x7e4   :  { %p1250_p3 = por %p1249_p2, %p1248_p1 }
 0x7e6   :  { %787 = vperm.xlu1 %1168, %v1020_v57   ;;  %p1251_p4 = pnand %p1250_p3, %p1244_p0 }
 0x7e7   :  { %782 = vperm.xlu0 %1167, %v1019_v60  }
 0x7eb   :  { %873 = vperm.xlu0 %1167, %v870_v61  }
 0x850   :  { %v1226_v62 = vpop.permute.xlu1 %1225 }
 0x851   :  { %v1221_v63 = vpop.permute.xlu0 %1220  ;;  %v1228_v39 = vunpack.i.h.bf16 %v1226_v62  ;;  %v1227_v0 = vunpack.i.l.bf16 %v1226_v62 }
 0x852   :  { %v1223_v1 = vunpack.i.h.bf16 %v1221_v63  ;;  %v1222_v2 = vunpack.i.l.bf16 %v1221_v63 }
 0x853   :  { %v1027_v40 = vpack.c.bf16 %v1228_v39, %v1227_v0 }
 0x854   :  { %v1024_v3 = vpack.c.bf16 %v1223_v1, %v1222_v2 }
 0x856   :  { %1140 = vmatprep.subr.msk.bf16.mxu0 %vm1581_vm7, %v1024_v3 }
 0x857   :  { %1141 = vmatpush3.bf16.msk.msra.mxu0 %vm1581_vm7, %v1024_v3 }
 0x858   :  { %1142 = vmatprep.subr.msk.bf16.mxu0 %vm1581_vm7, %v1027_v40 }
 0x85b   :  { %1143 = vmatpush3.bf16.msk.msra.mxu0 %vm1581_vm7, %v1027_v40 }
 0x85c   :  { %1144 = vmatprep.subr.bf16.mxu0 %v763_v49 }
 0x85f   :  { %1145 = vmatpush3.bf16.msra.mxu0 %v763_v49 }
 0x860   :  { %1146 = vmatprep.subr.bf16.mxu0 %v764_v46 }
 0x861   :  { %v778_v5 = vpop.permute.xlu1 %777 }
 0x862   :  { %v773_v4 = vpop.permute.xlu0 %772 }
 0x863   :  { %1147 = vmatpush3.bf16.msra.mxu0 %v764_v46 }
 0x865   :  { %v788_v10 = vpop.permute.xlu1 %787 }
 0x866   :  { %1149 = vmatmul.mubr.msk.bf16.vlgmr.msra.gmra.mrb[12].mxu0 %vm200_vm1, %v1242_v17  ;;  %v783_v6 = vpop.permute.xlu0 %782 }
 0x86a   :  { %v874_v34 = vpop.permute.xlu0 %873 }
 0x939   :  { %v1150_v7 = vpop.f32.mrb[12].mxu0 }
 0x93a   :  { %v849_v8 = vadd.f32 %v1150_v7, %v783_v6  ;;  %v840_v9 = vpop.f32.mrb[13].mxu0 }
 0x93b   :  { %v841_v11 = vadd.f32 %v840_v9, %v773_v4  ;;  %v1151_v12 = vpop.f32.mrb[14].mxu0 }
 0x93c   :  { %v857_v14 = vmax.f32 %v849_v8, 0.0  ;;  %v852_v31 = vadd.f32 %v1151_v12, %v788_v10  ;;  %v843_v15 = vpop.f32.mrb[15].mxu0 }
 0x93d   :  { %v855_v19 = vmax.f32 %v841_v11, 0.0  ;;  %v844_v23 = vadd.f32 %v843_v15, %v778_v5 }
 0x93e   :  { %v861_v26 = vadd.f32 %v857_v14, %v618_v13  ;;  %v858_v22 = vmax.f32 %v852_v31, 0.0 }
 0x93f   :  { %v859_v45 = vadd.f32 %v855_v19, %v616_v16  ;;  %v856_v50 = vmax.f32 %v844_v23, 0.0 }
 0x940   :  { %v862_v25 = vadd.f32 %v858_v22, %v619_v24  ;;  %v865_v48 = vmax.f32 %v861_v26, 0.0 }
 0x941   :  { %v860_v29 = vadd.f32 %v856_v50, %v617_v27  ;;  %v863_v53 = vmax.f32 %v859_v45, 0.0 }
 0x942   :  { %v866_v30 = vmax.f32 %v862_v25, 0.0 }
 0x943   :  { %v864_v33 = vmax.f32 %v860_v29, 0.0 }
 0x944   :  { %v869_v35 = vpack.c.bf16 %v866_v30, %v865_v48 }
 0x945   :  { %v868_v28 = vpack.c.bf16 %v864_v33, %v863_v53 }
 0x947   :  { %1153 = vmatpush3.bf16.msra.mxu1 %v868_v28 }
 0x948   :  { %1154 = vmatprep.subr.bf16.mxu1 %v1271_v41 }
 0x94b   :  { %1155 = vmatpush3.bf16.msra.mxu1 %v869_v35 }
 0x94e   :  { %1157 = vmatmul.mubr.msk.bf16.vlgmr.msra.gmra.mrb[12].mxu1 %vm876_vm9, %v867_v32 }
 0xa21   :  { %v914_v36 = vpop.f32.mrb[12].mxu1 }
 0xa22   :  { %v915_v51 = vadd.f32 %v914_v36, %v874_v34  ;;  %v1158_v54 = vpop.f32.mrb[13].mxu1 }
 0xa23   :  { %v917_v56 = vpop.f32.mrb[14].mxu1 }
 0xa24   :  { %920 = vst [vmem:[#allocation2] sm:$0xff] %v915_v51  ;;  %v1159_v58 = vpop.f32.mrb[15].mxu1 }
 0xa25   :  { %1254 = shalt.err (!%p1251_p4)
}
 0xa26   :  { %s1255_s28 = scalar_lea.hbm %s1670_s9, 128 }
 0xa27   :  { %p1256_p5 = scmp.ne.s32.totalorder %s1670_s9, %s1255_s28  ;;  %p1259_p6 = scmp.lt.u32.totalorder %s1255_s28, %s1670_s9 }
 0xa29   :  { %p1261_p7 = pnand %p1259_p6, %p1256_p5 }
 0xa2b   :  { %1264 = shalt.err (!%p1261_p7)
}
 0xa2c   :  { %930 = dma.vmem_to_hbm [thread:$0]  %s928_s25, 128, %s1670_s9, [#allocation3]  }
 0xa2d   :  { %1265 = dma.done.wait [#allocation3], 128  }
 0xa2e   :  { %1266 = vsyncadd [#allocation3], 4294967168 }
 0xa2f   :  { %934 = vsyncpa [#allocation3], 1 }

</bundles_post_ra>
